<compile_context>
chip_gen: v5e
topology: v5e:2x2
jax: 0.10.0
libtpu: 0.0.40
codegen_flags: <defaults>
</compile_context>

<pallas_src>
import functools

import jax
import jax.numpy as jnp
from jax.experimental import pallas as pl
from jax.experimental.pallas import tpu as pltpu

LATENT_DIM = 3
CH_IN = 120
BN_EPS = 1e-5
LANES = 128


def _align8(n):
    return (n + 7) // 8 * 8


# ------------------------- static slab layout -------------------------------
# (name, fan_in, fan_out) in forward order.  fc_mu / fc_var are fused.
_W_BLOCKS = [
    ("enc0", CH_IN, 60),
    ("enc1", 60, 30),
    ("enc2", 30, 10),
    ("fc_mv", 10, 2 * LATENT_DIM),
    ("dec0", LATENT_DIM, 10),
    ("dec1", 10, 30),
    ("dec2", 30, 60),
    ("dec3", 60, CH_IN),
]
_W_OFFS = {}
_off = 0
for _name, _fin, _fout in _W_BLOCKS:
    _W_OFFS[_name] = _off
    _off += _align8(_fin)          # every block starts on a sublane boundary
W_SLAB_ROWS = _off                 # 352

# one row per bias / gamma / beta vector
_V_ROWS = {
    "enc0_g": 0, "enc0_b": 1,
    "enc1_g": 2, "enc1_b": 3,
    "enc2_g": 4, "enc2_b": 5,
    "fc_mv_bias": 6,
    "dec0_g": 7, "dec0_b": 8,
    "dec1_g": 9, "dec1_b": 10,
    "dec2_g": 11, "dec2_b": 12,
    "dec3_bias": 13,
}
V_SLAB_ROWS = _align8(len(_V_ROWS))  # 16


# ------------------------------- kernel --------------------------------------
def vae_kernel(x_ref, eps_ref, w_ref, v_ref, recon_ref, muvar_ref):
    h = x_ref[...].astype(jnp.float32)

    def linear(h, name, fin, fout):
        off = _W_OFFS[name]
        w = w_ref[off:off + fin, 0:fout]           # static slab slice (no copy)
        return jnp.dot(h, w, preferred_element_type=jnp.float32)

    def vec(name, f):
        r = _V_ROWS[name]
        return v_ref[r:r + 1, 0:f]                 # (1, f) for broadcast

    def bn_tanh(h, layer, f):
        # training-mode BN: batch mean / biased batch var, fused affine.
        mean = jnp.mean(h, axis=0, keepdims=True)
        mean_sq = jnp.mean(h * h, axis=0, keepdims=True)   # back-to-back XLU reductions
        var = mean_sq - mean * mean
        scale = vec(layer + "_g", f) * jax.lax.rsqrt(var + BN_EPS)
        shift = vec(layer + "_b", f) - mean * scale
        return jnp.tanh(h * scale + shift)         # single FMA on the (B, F) tensor

    # ---- encoder: 3 x (Linear[no bias] -> BN -> Tanh) ----
    h = linear(h, "enc0", CH_IN, 60); h = bn_tanh(h, "enc0", 60)
    h = linear(h, "enc1", 60, 30);    h = bn_tanh(h, "enc1", 30)
    h = linear(h, "enc2", 30, 10);    h = bn_tanh(h, "enc2", 10)

    # ---- fused fc_mu / fc_var : one (10, 6) matmul ----
    mv = linear(h, "fc_mv", 10, 2 * LATENT_DIM) + vec("fc_mv_bias", 2 * LATENT_DIM)
    mu = mv[:, 0:LATENT_DIM]
    logvar = mv[:, LATENT_DIM:2 * LATENT_DIM]

    # ---- reparameterization: z = eps * exp(0.5*logvar) + mu ----
    z = eps_ref[...].astype(jnp.float32) * jnp.exp(0.5 * logvar) + mu

    # ---- decoder: 3 x (Linear[no bias] -> BN -> Tanh), then Linear + bias ----
    h = linear(z, "dec0", LATENT_DIM, 10); h = bn_tanh(h, "dec0", 10)
    h = linear(h, "dec1", 10, 30);         h = bn_tanh(h, "dec1", 30)
    h = linear(h, "dec2", 30, 60);         h = bn_tanh(h, "dec2", 60)
    h = linear(h, "dec3", 60, CH_IN) + vec("dec3_bias", CH_IN)

    recon_ref[...] = h.astype(recon_ref.dtype)
    muvar_ref[...] = mv.astype(muvar_ref.dtype)


# ------------------------------ parameters -----------------------------------
def init_params(key):
    """Synthetic parameters.  Weights stored as (in, out) == PyTorch W^T.
    Linear biases that feed a training-mode BatchNorm are omitted: the batch
    mean subtraction cancels them exactly, so the forward is unchanged."""
    params = {}

    def lin_w(k, fin, fout):
        s = 1.0 / jnp.sqrt(jnp.float32(fin))
        return jax.random.uniform(k, (fin, fout), jnp.float32, -s, s)

    def lin_b(k, fin, fout):
        s = 1.0 / jnp.sqrt(jnp.float32(fin))
        return jax.random.uniform(k, (fout,), jnp.float32, -s, s)

    keys = iter(jax.random.split(key, 32))

    for i, (fin, fout) in enumerate([(CH_IN, 60), (60, 30), (30, 10)]):
        params[f"enc{i}_w"] = lin_w(next(keys), fin, fout)
        params[f"enc{i}_g"] = jnp.ones((fout,), jnp.float32)   # BN gamma
        params[f"enc{i}_b"] = jnp.zeros((fout,), jnp.float32)  # BN beta

    w_mu = lin_w(next(keys), 10, LATENT_DIM)
    b_mu = lin_b(next(keys), 10, LATENT_DIM)
    w_var = lin_w(next(keys), 10, LATENT_DIM)
    b_var = lin_b(next(keys), 10, LATENT_DIM)
    params["fc_mv_w"] = jnp.concatenate([w_mu, w_var], axis=1)      # (10, 6)
    params["fc_mv_bias"] = jnp.concatenate([b_mu, b_var], axis=0)   # (6,)

    for i, (fin, fout) in enumerate([(LATENT_DIM, 10), (10, 30), (30, 60)]):
        params[f"dec{i}_w"] = lin_w(next(keys), fin, fout)
        params[f"dec{i}_g"] = jnp.ones((fout,), jnp.float32)
        params[f"dec{i}_b"] = jnp.zeros((fout,), jnp.float32)

    params["dec3_w"] = lin_w(next(keys), 60, CH_IN)
    params["dec3_bias"] = lin_b(next(keys), 60, CH_IN)
    return params


def pack_params(params):
    """Pack all parameters into two lane-aligned slabs (host-side, one time)."""
    w_slab = jnp.zeros((W_SLAB_ROWS, LANES), jnp.float32)
    for name, fin, fout in _W_BLOCKS:
        off = _W_OFFS[name]
        w_slab = w_slab.at[off:off + fin, 0:fout].set(params[name + "_w"])
    v_slab = jnp.zeros((V_SLAB_ROWS, LANES), jnp.float32)
    for name, row in _V_ROWS.items():
        v = params[name]
        v_slab = v_slab.at[row, 0:v.shape[0]].set(v)
    return w_slab, v_slab


# -------------------------------- wrapper -------------------------------------
@functools.partial(jax.jit, static_argnames=())
def vae_forward(x, eps, w_slab, v_slab):
    B = x.shape[0]
    vmem = pl.BlockSpec(memory_space=pltpu.MemorySpace.VMEM)

    flops = 2 * B * sum(fin * fout for _, fin, fout in _W_BLOCKS)
    bytes_accessed = 4 * (w_slab.size + v_slab.size + x.size + eps.size
                          + B * CH_IN + B * 2 * LATENT_DIM)
    transcendentals = B * (2 * (60 + 30 + 10 + 10 + 30 + 60) + LATENT_DIM)

    recon, muvar = pl.pallas_call(
        vae_kernel,
        out_shape=(
            jax.ShapeDtypeStruct((B, CH_IN), jnp.float32),           # output
            jax.ShapeDtypeStruct((B, 2 * LATENT_DIM), jnp.float32),  # [mu | logvar]
        ),
        in_specs=[vmem, vmem, vmem, vmem],
        out_specs=(vmem, vmem),
        cost_estimate=pl.CostEstimate(
            flops=int(flops),
            bytes_accessed=int(bytes_accessed),
            transcendentals=int(transcendentals)),
    )(x, eps, w_slab, v_slab)

    return {"output": recon,
            "mu": muvar[:, :LATENT_DIM],
            "logvar": muvar[:, LATENT_DIM:]}


# ------------------------- pure-JAX reference ---------------------------------
def vae_ref(x, eps, params):
    def bn(h, g, b):
        m = jnp.mean(h, axis=0, keepdims=True)
        v = jnp.mean((h - m) ** 2, axis=0, keepdims=True)
        return g * (h - m) / jnp.sqrt(v + BN_EPS) + b

    h = x
    for i in range(3):
        h = jnp.tanh(bn(h @ params[f"enc{i}_w"], params[f"enc{i}_g"], params[f"enc{i}_b"]))
    mv = h @ params["fc_mv_w"] + params["fc_mv_bias"]
    mu, logvar = mv[:, :LATENT_DIM], mv[:, LATENT_DIM:]
    z = eps * jnp.exp(0.5 * logvar) + mu
    h = z
    for i in range(3):
        h = jnp.tanh(bn(h @ params[f"dec{i}_w"], params[f"dec{i}_g"], params[f"dec{i}_b"]))
    out = h @ params["dec3_w"] + params["dec3_bias"]
    return out, mu, logvar


if __name__ == "__main__":
    key = jax.random.PRNGKey(0)
    k_x, k_eps, k_p = jax.random.split(key, 3)

    B = 8
    x = jax.random.normal(k_x, (B, CH_IN), jnp.float32)
    # TODO(synk): torch.randn_like noise is generated outside the kernel so the
    # forward is a deterministic function of its inputs.
    eps = jax.random.normal(k_eps, (B, LATENT_DIM), jnp.float32)

    params = init_params(k_p)
    w_slab, v_slab = pack_params(params)

    out = vae_forward(x, eps, w_slab, v_slab)
    jax.block_until_ready(out)

    assert out["output"].shape == (B, CH_IN)
    assert out["mu"].shape == (B, LATENT_DIM)
    assert out["logvar"].shape == (B, LATENT_DIM)
    assert all(bool(jnp.all(jnp.isfinite(v))) for v in out.values())

    # correctness vs. pure-JAX reference (two-pass BN variance, same params)
    ref_out, ref_mu, ref_lv = vae_ref(x, eps, params)
    assert bool(jnp.allclose(out["output"], ref_out, atol=2e-3, rtol=2e-3))
    assert bool(jnp.allclose(out["mu"], ref_mu, atol=2e-3, rtol=2e-3))
    assert bool(jnp.allclose(out["logvar"], ref_lv, atol=2e-3, rtol=2e-3))

    print("KERNEL_OK")
</pallas_src>

<mosaic_0001>
module attributes {stable_mosaic.version = 11 : i64} {
  func.func @vae_kernel(%arg0: memref<8x120xf32, #tpu.memory_space<vmem>>, %arg1: memref<8x3xf32, #tpu.memory_space<vmem>>, %arg2: memref<352x128xf32, #tpu.memory_space<vmem>>, %arg3: memref<16x128xf32, #tpu.memory_space<vmem>>, %arg4: memref<8x120xf32, #tpu.memory_space<vmem>>, %arg5: memref<8x6xf32, #tpu.memory_space<vmem>>) attributes {dimension_semantics = [], scalar_prefetch = 0 : i64, scratch_operands = 0 : i64, tpu.core_type = #tpu.core_type<tc>} {
    %c0 = arith.constant 0 : index
    %c0_0 = arith.constant 0 : index
    %0 = vector.load %arg0[%c0, %c0_0] : memref<8x120xf32, #tpu.memory_space<vmem>>, vector<8x120xf32>
    %c0_1 = arith.constant 0 : index
    %c0_2 = arith.constant 0 : index
    %1 = vector.load %arg2[%c0_1, %c0_2] : memref<352x128xf32, #tpu.memory_space<vmem>>, vector<120x60xf32>
    %cst = arith.constant dense<0.000000e+00> : vector<8x60xf32>
    %2 = tpu.matmul %0, %1, %cst {dimension_numbers = #tpu.dot_dimension_numbers<[1], [0], [0], [1], [0, 0, 1, 1], [], []>} : vector<8x120xf32>, vector<120x60xf32>, vector<8x60xf32> -> vector<8x60xf32>
    %cst_3 = arith.constant dense<0.000000e+00> : vector<60xf32>
    %3 = vector.multi_reduction <add>, %2, %cst_3 [0] : vector<8x60xf32> to vector<60xf32>
    %4 = vector.shape_cast %3 : vector<60xf32> to vector<1x60xf32>
    %cst_4 = arith.constant 8.000000e+00 : f32
    %5 = vector.broadcast %cst_4 : f32 to vector<1x60xf32>
    %6 = arith.divf %4, %5 : vector<1x60xf32>
    %7 = arith.mulf %2, %2 : vector<8x60xf32>
    %cst_5 = arith.constant dense<0.000000e+00> : vector<60xf32>
    %8 = vector.multi_reduction <add>, %7, %cst_5 [0] : vector<8x60xf32> to vector<60xf32>
    %9 = vector.shape_cast %8 : vector<60xf32> to vector<1x60xf32>
    %cst_6 = arith.constant 8.000000e+00 : f32
    %10 = vector.broadcast %cst_6 : f32 to vector<1x60xf32>
    %11 = arith.divf %9, %10 : vector<1x60xf32>
    %12 = arith.mulf %6, %6 : vector<1x60xf32>
    %13 = arith.subf %11, %12 : vector<1x60xf32>
    %c0_7 = arith.constant 0 : index
    %c0_8 = arith.constant 0 : index
    %14 = vector.load %arg3[%c0_7, %c0_8] : memref<16x128xf32, #tpu.memory_space<vmem>>, vector<1x60xf32>
    %cst_9 = arith.constant 9.99999974E-6 : f32
    %15 = vector.broadcast %cst_9 : f32 to vector<1x60xf32>
    %16 = arith.addf %13, %15 : vector<1x60xf32>
    %17 = math.rsqrt %16 : vector<1x60xf32>
    %18 = arith.mulf %14, %17 : vector<1x60xf32>
    %c1 = arith.constant 1 : index
    %c0_10 = arith.constant 0 : index
    %19 = vector.load %arg3[%c1, %c0_10] : memref<16x128xf32, #tpu.memory_space<vmem>>, vector<1x60xf32>
    %20 = arith.mulf %6, %18 : vector<1x60xf32>
    %21 = arith.subf %19, %20 : vector<1x60xf32>
    %22 = vector.broadcast %18 : vector<1x60xf32> to vector<8x60xf32>
    %23 = arith.mulf %2, %22 : vector<8x60xf32>
    %24 = vector.broadcast %21 : vector<1x60xf32> to vector<8x60xf32>
    %25 = arith.addf %23, %24 : vector<8x60xf32>
    %26 = math.tanh %25 : vector<8x60xf32>
    %c120 = arith.constant 120 : index
    %c0_11 = arith.constant 0 : index
    %27 = vector.load %arg2[%c120, %c0_11] : memref<352x128xf32, #tpu.memory_space<vmem>>, vector<60x30xf32>
    %cst_12 = arith.constant dense<0.000000e+00> : vector<8x30xf32>
    %28 = tpu.matmul %26, %27, %cst_12 {dimension_numbers = #tpu.dot_dimension_numbers<[1], [0], [0], [1], [0, 0, 1, 1], [], []>} : vector<8x60xf32>, vector<60x30xf32>, vector<8x30xf32> -> vector<8x30xf32>
    %cst_13 = arith.constant dense<0.000000e+00> : vector<30xf32>
    %29 = vector.multi_reduction <add>, %28, %cst_13 [0] : vector<8x30xf32> to vector<30xf32>
    %30 = vector.shape_cast %29 : vector<30xf32> to vector<1x30xf32>
    %cst_14 = arith.constant 8.000000e+00 : f32
    %31 = vector.broadcast %cst_14 : f32 to vector<1x30xf32>
    %32 = arith.divf %30, %31 : vector<1x30xf32>
    %33 = arith.mulf %28, %28 : vector<8x30xf32>
    %cst_15 = arith.constant dense<0.000000e+00> : vector<30xf32>
    %34 = vector.multi_reduction <add>, %33, %cst_15 [0] : vector<8x30xf32> to vector<30xf32>
    %35 = vector.shape_cast %34 : vector<30xf32> to vector<1x30xf32>
    %cst_16 = arith.constant 8.000000e+00 : f32
    %36 = vector.broadcast %cst_16 : f32 to vector<1x30xf32>
    %37 = arith.divf %35, %36 : vector<1x30xf32>
    %38 = arith.mulf %32, %32 : vector<1x30xf32>
    %39 = arith.subf %37, %38 : vector<1x30xf32>
    %c2 = arith.constant 2 : index
    %c0_17 = arith.constant 0 : index
    %40 = vector.load %arg3[%c2, %c0_17] : memref<16x128xf32, #tpu.memory_space<vmem>>, vector<1x30xf32>
    %cst_18 = arith.constant 9.99999974E-6 : f32
    %41 = vector.broadcast %cst_18 : f32 to vector<1x30xf32>
    %42 = arith.addf %39, %41 : vector<1x30xf32>
    %43 = math.rsqrt %42 : vector<1x30xf32>
    %44 = arith.mulf %40, %43 : vector<1x30xf32>
    %c3 = arith.constant 3 : index
    %c0_19 = arith.constant 0 : index
    %45 = vector.load %arg3[%c3, %c0_19] : memref<16x128xf32, #tpu.memory_space<vmem>>, vector<1x30xf32>
    %46 = arith.mulf %32, %44 : vector<1x30xf32>
    %47 = arith.subf %45, %46 : vector<1x30xf32>
    %48 = vector.broadcast %44 : vector<1x30xf32> to vector<8x30xf32>
    %49 = arith.mulf %28, %48 : vector<8x30xf32>
    %50 = vector.broadcast %47 : vector<1x30xf32> to vector<8x30xf32>
    %51 = arith.addf %49, %50 : vector<8x30xf32>
    %52 = math.tanh %51 : vector<8x30xf32>
    %c184 = arith.constant 184 : index
    %c0_20 = arith.constant 0 : index
    %53 = vector.load %arg2[%c184, %c0_20] : memref<352x128xf32, #tpu.memory_space<vmem>>, vector<30x10xf32>
    %cst_21 = arith.constant dense<0.000000e+00> : vector<8x10xf32>
    %54 = tpu.matmul %52, %53, %cst_21 {dimension_numbers = #tpu.dot_dimension_numbers<[1], [0], [0], [1], [0, 0, 1, 1], [], []>} : vector<8x30xf32>, vector<30x10xf32>, vector<8x10xf32> -> vector<8x10xf32>
    %cst_22 = arith.constant dense<0.000000e+00> : vector<10xf32>
    %55 = vector.multi_reduction <add>, %54, %cst_22 [0] : vector<8x10xf32> to vector<10xf32>
    %56 = vector.shape_cast %55 : vector<10xf32> to vector<1x10xf32>
    %cst_23 = arith.constant 8.000000e+00 : f32
    %57 = vector.broadcast %cst_23 : f32 to vector<1x10xf32>
    %58 = arith.divf %56, %57 : vector<1x10xf32>
    %59 = arith.mulf %54, %54 : vector<8x10xf32>
    %cst_24 = arith.constant dense<0.000000e+00> : vector<10xf32>
    %60 = vector.multi_reduction <add>, %59, %cst_24 [0] : vector<8x10xf32> to vector<10xf32>
    %61 = vector.shape_cast %60 : vector<10xf32> to vector<1x10xf32>
    %cst_25 = arith.constant 8.000000e+00 : f32
    %62 = vector.broadcast %cst_25 : f32 to vector<1x10xf32>
    %63 = arith.divf %61, %62 : vector<1x10xf32>
    %64 = arith.mulf %58, %58 : vector<1x10xf32>
    %65 = arith.subf %63, %64 : vector<1x10xf32>
    %c4 = arith.constant 4 : index
    %c0_26 = arith.constant 0 : index
    %66 = vector.load %arg3[%c4, %c0_26] : memref<16x128xf32, #tpu.memory_space<vmem>>, vector<1x10xf32>
    %cst_27 = arith.constant 9.99999974E-6 : f32
    %67 = vector.broadcast %cst_27 : f32 to vector<1x10xf32>
    %68 = arith.addf %65, %67 : vector<1x10xf32>
    %69 = math.rsqrt %68 : vector<1x10xf32>
    %70 = arith.mulf %66, %69 : vector<1x10xf32>
    %c5 = arith.constant 5 : index
    %c0_28 = arith.constant 0 : index
    %71 = vector.load %arg3[%c5, %c0_28] : memref<16x128xf32, #tpu.memory_space<vmem>>, vector<1x10xf32>
    %72 = arith.mulf %58, %70 : vector<1x10xf32>
    %73 = arith.subf %71, %72 : vector<1x10xf32>
    %74 = vector.broadcast %70 : vector<1x10xf32> to vector<8x10xf32>
    %75 = arith.mulf %54, %74 : vector<8x10xf32>
    %76 = vector.broadcast %73 : vector<1x10xf32> to vector<8x10xf32>
    %77 = arith.addf %75, %76 : vector<8x10xf32>
    %78 = math.tanh %77 : vector<8x10xf32>
    %c216 = arith.constant 216 : index
    %c0_29 = arith.constant 0 : index
    %79 = vector.load %arg2[%c216, %c0_29] : memref<352x128xf32, #tpu.memory_space<vmem>>, vector<10x6xf32>
    %cst_30 = arith.constant dense<0.000000e+00> : vector<8x6xf32>
    %80 = tpu.matmul %78, %79, %cst_30 {dimension_numbers = #tpu.dot_dimension_numbers<[1], [0], [0], [1], [0, 0, 1, 1], [], []>} : vector<8x10xf32>, vector<10x6xf32>, vector<8x6xf32> -> vector<8x6xf32>
    %c6 = arith.constant 6 : index
    %c0_31 = arith.constant 0 : index
    %81 = vector.load %arg3[%c6, %c0_31] : memref<16x128xf32, #tpu.memory_space<vmem>>, vector<1x6xf32>
    %82 = vector.broadcast %81 : vector<1x6xf32> to vector<8x6xf32>
    %83 = arith.addf %80, %82 : vector<8x6xf32>
    %84 = vector.extract_strided_slice %83 {offsets = [0, 0], sizes = [8, 3], strides = [1, 1]} : vector<8x6xf32> to vector<8x3xf32>
    %85 = vector.extract_strided_slice %83 {offsets = [0, 3], sizes = [8, 3], strides = [1, 1]} : vector<8x6xf32> to vector<8x3xf32>
    %c0_32 = arith.constant 0 : index
    %c0_33 = arith.constant 0 : index
    %86 = vector.load %arg1[%c0_32, %c0_33] : memref<8x3xf32, #tpu.memory_space<vmem>>, vector<8x3xf32>
    %cst_34 = arith.constant 5.000000e-01 : f32
    %87 = vector.broadcast %cst_34 : f32 to vector<8x3xf32>
    %88 = arith.mulf %87, %85 : vector<8x3xf32>
    %89 = math.exp %88 : vector<8x3xf32>
    %90 = arith.mulf %86, %89 : vector<8x3xf32>
    %91 = arith.addf %90, %84 : vector<8x3xf32>
    %c232 = arith.constant 232 : index
    %c0_35 = arith.constant 0 : index
    %92 = vector.load %arg2[%c232, %c0_35] : memref<352x128xf32, #tpu.memory_space<vmem>>, vector<3x10xf32>
    %cst_36 = arith.constant dense<0.000000e+00> : vector<8x10xf32>
    %93 = tpu.matmul %91, %92, %cst_36 {dimension_numbers = #tpu.dot_dimension_numbers<[1], [0], [0], [1], [0, 0, 1, 1], [], []>} : vector<8x3xf32>, vector<3x10xf32>, vector<8x10xf32> -> vector<8x10xf32>
    %cst_37 = arith.constant dense<0.000000e+00> : vector<10xf32>
    %94 = vector.multi_reduction <add>, %93, %cst_37 [0] : vector<8x10xf32> to vector<10xf32>
    %95 = vector.shape_cast %94 : vector<10xf32> to vector<1x10xf32>
    %cst_38 = arith.constant 8.000000e+00 : f32
    %96 = vector.broadcast %cst_38 : f32 to vector<1x10xf32>
    %97 = arith.divf %95, %96 : vector<1x10xf32>
    %98 = arith.mulf %93, %93 : vector<8x10xf32>
    %cst_39 = arith.constant dense<0.000000e+00> : vector<10xf32>
    %99 = vector.multi_reduction <add>, %98, %cst_39 [0] : vector<8x10xf32> to vector<10xf32>
    %100 = vector.shape_cast %99 : vector<10xf32> to vector<1x10xf32>
    %cst_40 = arith.constant 8.000000e+00 : f32
    %101 = vector.broadcast %cst_40 : f32 to vector<1x10xf32>
    %102 = arith.divf %100, %101 : vector<1x10xf32>
    %103 = arith.mulf %97, %97 : vector<1x10xf32>
    %104 = arith.subf %102, %103 : vector<1x10xf32>
    %c7 = arith.constant 7 : index
    %c0_41 = arith.constant 0 : index
    %105 = vector.load %arg3[%c7, %c0_41] : memref<16x128xf32, #tpu.memory_space<vmem>>, vector<1x10xf32>
    %cst_42 = arith.constant 9.99999974E-6 : f32
    %106 = vector.broadcast %cst_42 : f32 to vector<1x10xf32>
    %107 = arith.addf %104, %106 : vector<1x10xf32>
    %108 = math.rsqrt %107 : vector<1x10xf32>
    %109 = arith.mulf %105, %108 : vector<1x10xf32>
    %c8 = arith.constant 8 : index
    %c0_43 = arith.constant 0 : index
    %110 = vector.load %arg3[%c8, %c0_43] : memref<16x128xf32, #tpu.memory_space<vmem>>, vector<1x10xf32>
    %111 = arith.mulf %97, %109 : vector<1x10xf32>
    %112 = arith.subf %110, %111 : vector<1x10xf32>
    %113 = vector.broadcast %109 : vector<1x10xf32> to vector<8x10xf32>
    %114 = arith.mulf %93, %113 : vector<8x10xf32>
    %115 = vector.broadcast %112 : vector<1x10xf32> to vector<8x10xf32>
    %116 = arith.addf %114, %115 : vector<8x10xf32>
    %117 = math.tanh %116 : vector<8x10xf32>
    %c240 = arith.constant 240 : index
    %c0_44 = arith.constant 0 : index
    %118 = vector.load %arg2[%c240, %c0_44] : memref<352x128xf32, #tpu.memory_space<vmem>>, vector<10x30xf32>
    %cst_45 = arith.constant dense<0.000000e+00> : vector<8x30xf32>
    %119 = tpu.matmul %117, %118, %cst_45 {dimension_numbers = #tpu.dot_dimension_numbers<[1], [0], [0], [1], [0, 0, 1, 1], [], []>} : vector<8x10xf32>, vector<10x30xf32>, vector<8x30xf32> -> vector<8x30xf32>
    %cst_46 = arith.constant dense<0.000000e+00> : vector<30xf32>
    %120 = vector.multi_reduction <add>, %119, %cst_46 [0] : vector<8x30xf32> to vector<30xf32>
    %121 = vector.shape_cast %120 : vector<30xf32> to vector<1x30xf32>
    %cst_47 = arith.constant 8.000000e+00 : f32
    %122 = vector.broadcast %cst_47 : f32 to vector<1x30xf32>
    %123 = arith.divf %121, %122 : vector<1x30xf32>
    %124 = arith.mulf %119, %119 : vector<8x30xf32>
    %cst_48 = arith.constant dense<0.000000e+00> : vector<30xf32>
    %125 = vector.multi_reduction <add>, %124, %cst_48 [0] : vector<8x30xf32> to vector<30xf32>
    %126 = vector.shape_cast %125 : vector<30xf32> to vector<1x30xf32>
    %cst_49 = arith.constant 8.000000e+00 : f32
    %127 = vector.broadcast %cst_49 : f32 to vector<1x30xf32>
    %128 = arith.divf %126, %127 : vector<1x30xf32>
    %129 = arith.mulf %123, %123 : vector<1x30xf32>
    %130 = arith.subf %128, %129 : vector<1x30xf32>
    %c9 = arith.constant 9 : index
    %c0_50 = arith.constant 0 : index
    %131 = vector.load %arg3[%c9, %c0_50] : memref<16x128xf32, #tpu.memory_space<vmem>>, vector<1x30xf32>
    %cst_51 = arith.constant 9.99999974E-6 : f32
    %132 = vector.broadcast %cst_51 : f32 to vector<1x30xf32>
    %133 = arith.addf %130, %132 : vector<1x30xf32>
    %134 = math.rsqrt %133 : vector<1x30xf32>
    %135 = arith.mulf %131, %134 : vector<1x30xf32>
    %c10 = arith.constant 10 : index
    %c0_52 = arith.constant 0 : index
    %136 = vector.load %arg3[%c10, %c0_52] : memref<16x128xf32, #tpu.memory_space<vmem>>, vector<1x30xf32>
    %137 = arith.mulf %123, %135 : vector<1x30xf32>
    %138 = arith.subf %136, %137 : vector<1x30xf32>
    %139 = vector.broadcast %135 : vector<1x30xf32> to vector<8x30xf32>
    %140 = arith.mulf %119, %139 : vector<8x30xf32>
    %141 = vector.broadcast %138 : vector<1x30xf32> to vector<8x30xf32>
    %142 = arith.addf %140, %141 : vector<8x30xf32>
    %143 = math.tanh %142 : vector<8x30xf32>
    %c256 = arith.constant 256 : index
    %c0_53 = arith.constant 0 : index
    %144 = vector.load %arg2[%c256, %c0_53] : memref<352x128xf32, #tpu.memory_space<vmem>>, vector<30x60xf32>
    %cst_54 = arith.constant dense<0.000000e+00> : vector<8x60xf32>
    %145 = tpu.matmul %143, %144, %cst_54 {dimension_numbers = #tpu.dot_dimension_numbers<[1], [0], [0], [1], [0, 0, 1, 1], [], []>} : vector<8x30xf32>, vector<30x60xf32>, vector<8x60xf32> -> vector<8x60xf32>
    %cst_55 = arith.constant dense<0.000000e+00> : vector<60xf32>
    %146 = vector.multi_reduction <add>, %145, %cst_55 [0] : vector<8x60xf32> to vector<60xf32>
    %147 = vector.shape_cast %146 : vector<60xf32> to vector<1x60xf32>
    %cst_56 = arith.constant 8.000000e+00 : f32
    %148 = vector.broadcast %cst_56 : f32 to vector<1x60xf32>
    %149 = arith.divf %147, %148 : vector<1x60xf32>
    %150 = arith.mulf %145, %145 : vector<8x60xf32>
    %cst_57 = arith.constant dense<0.000000e+00> : vector<60xf32>
    %151 = vector.multi_reduction <add>, %150, %cst_57 [0] : vector<8x60xf32> to vector<60xf32>
    %152 = vector.shape_cast %151 : vector<60xf32> to vector<1x60xf32>
    %cst_58 = arith.constant 8.000000e+00 : f32
    %153 = vector.broadcast %cst_58 : f32 to vector<1x60xf32>
    %154 = arith.divf %152, %153 : vector<1x60xf32>
    %155 = arith.mulf %149, %149 : vector<1x60xf32>
    %156 = arith.subf %154, %155 : vector<1x60xf32>
    %c11 = arith.constant 11 : index
    %c0_59 = arith.constant 0 : index
    %157 = vector.load %arg3[%c11, %c0_59] : memref<16x128xf32, #tpu.memory_space<vmem>>, vector<1x60xf32>
    %cst_60 = arith.constant 9.99999974E-6 : f32
    %158 = vector.broadcast %cst_60 : f32 to vector<1x60xf32>
    %159 = arith.addf %156, %158 : vector<1x60xf32>
    %160 = math.rsqrt %159 : vector<1x60xf32>
    %161 = arith.mulf %157, %160 : vector<1x60xf32>
    %c12 = arith.constant 12 : index
    %c0_61 = arith.constant 0 : index
    %162 = vector.load %arg3[%c12, %c0_61] : memref<16x128xf32, #tpu.memory_space<vmem>>, vector<1x60xf32>
    %163 = arith.mulf %149, %161 : vector<1x60xf32>
    %164 = arith.subf %162, %163 : vector<1x60xf32>
    %165 = vector.broadcast %161 : vector<1x60xf32> to vector<8x60xf32>
    %166 = arith.mulf %145, %165 : vector<8x60xf32>
    %167 = vector.broadcast %164 : vector<1x60xf32> to vector<8x60xf32>
    %168 = arith.addf %166, %167 : vector<8x60xf32>
    %169 = math.tanh %168 : vector<8x60xf32>
    %c288 = arith.constant 288 : index
    %c0_62 = arith.constant 0 : index
    %170 = vector.load %arg2[%c288, %c0_62] : memref<352x128xf32, #tpu.memory_space<vmem>>, vector<60x120xf32>
    %cst_63 = arith.constant dense<0.000000e+00> : vector<8x120xf32>
    %171 = tpu.matmul %169, %170, %cst_63 {dimension_numbers = #tpu.dot_dimension_numbers<[1], [0], [0], [1], [0, 0, 1, 1], [], []>} : vector<8x60xf32>, vector<60x120xf32>, vector<8x120xf32> -> vector<8x120xf32>
    %c13 = arith.constant 13 : index
    %c0_64 = arith.constant 0 : index
    %172 = vector.load %arg3[%c13, %c0_64] : memref<16x128xf32, #tpu.memory_space<vmem>>, vector<1x120xf32>
    %173 = vector.broadcast %172 : vector<1x120xf32> to vector<8x120xf32>
    %174 = arith.addf %171, %173 : vector<8x120xf32>
    %c0_65 = arith.constant 0 : index
    %c0_66 = arith.constant 0 : index
    %175 = vector.load %arg4[%c0_65, %c0_66] : memref<8x120xf32, #tpu.memory_space<vmem>>, vector<8x120xf32>
    tpu.vector_store %arg4[%c0_65, %c0_66], %174 {strides = array<i32>} : memref<8x120xf32, #tpu.memory_space<vmem>>, vector<8x120xf32>,
    %c0_67 = arith.constant 0 : index
    %c0_68 = arith.constant 0 : index
    %176 = vector.load %arg5[%c0_67, %c0_68] : memref<8x6xf32, #tpu.memory_space<vmem>>, vector<8x6xf32>
    tpu.vector_store %arg5[%c0_67, %c0_68], %83 {strides = array<i32>} : memref<8x6xf32, #tpu.memory_space<vmem>>, vector<8x6xf32>,
    return
  }
}

</mosaic_0001>

<bundles_post_ra>
// kernel: vae_forward.1
= control target key start
LH: loop header
LB: loop body
LE: loop exit
PB: predicated region body
PF: predicated region fallthrough
CT: control target
= control target key end

     0   :  { %11 = vsyncpa [#allocation3], 0  ;;  %s822_s0 = inlined_call_operand.vmem [shape: f32[8,120], index: 0, kind: input, shape index: {}]   ;;  %s823_s1 = inlined_call_operand.vmem [shape: f32[8,3], index: 1, kind: input, shape index: {}]   ;;  %s824_s2 = inlined_call_operand.hbm [shape: f32[352,128], index: 2, kind: input, shape index: {}]   ;;  %s825_s3 = inlined_call_operand.hbm [shape: f32[16,128], index: 3, kind: input, shape index: {}]   ;;  %s826_s4 = inlined_call_operand.hbm [shape: f32[8,120], index: 4, kind: output, shape index: {0}]   ;;  %s827_s5 = inlined_call_operand.vmem [shape: f32[8,6], index: 5, kind: output, shape index: {1}]  }
   0x1   :  { %12 = vsyncpa [#allocation6], 0 }
   0x2   :  { %13 = vsyncpa [#allocation4], 0  ;;  %s22_s20 = sshll.u32 %s824_s2, 4  ;;  %s727_s21 = smov [#allocation2]   ;;  %s23_s20 = int_to_ptr.hbm [resolvable:$true] %s22_s20 }
   0x3   :  { %s24_s22 = sshll.u32 %s727_s21, 4  ;;  %s35_s25 = sshll.u32 %s825_s3, 4  ;;  %s25_s22 = int_to_ptr.vmem [resolvable:$true] %s24_s22  ;;  %s36_s25 = int_to_ptr.hbm [resolvable:$true] %s35_s25 }
   0x4   :  { %s728_s26 = smov 128   ;;  %s729_s27 = smov 8  }
   0x5   :  { %30 = dma.hbm_to_vmem [thread:$0]  %s23_s20, 5632, %s25_s22, [#allocation3], %s728_s26, %s728_s26, %s729_s27  }
   0x6   :  { %s730_s28 = smov [#allocation5]  }
   0x7   :  { %s37_s29 = sshll.u32 %s730_s28, 4  ;;  %s38_s29 = int_to_ptr.vmem [resolvable:$true] %s37_s29 }
   0x8   :  { %43 = dma.hbm_to_vmem [thread:$0]  %s36_s25, 256, %s38_s29, [#allocation6], %s728_s26, %s728_s26, %s729_s27  }
   0x9   :  { %721 = dma.done.wait [#allocation3], 5632  }
   0xa   :  { %722 = vsyncadd [#allocation3], 4294961664 }
   0xb   :  { %723 = dma.done.wait [#allocation6], 256  }
   0xc   :  { %724 = vsyncadd [#allocation6], 4294967040  ;;  %v67_v0 = vld [vmem:[#allocation2 + $0x70] sm:$0xff]  ;;  %v66_v1 = vld [vmem:[#allocation2 + $0x68] sm:$0xff]  ;;  %vm68_vm0 = vcmask 982016   ;;  %v731_v16 = vmov 8.0  }
   0xd   :  { %73 = vmatpush.msra.mxu0 %v67_v0  ;;  %v65_v2 = vld [vmem:[#allocation2 + $0x60] sm:$0xff]  ;;  %v64_v3 = vld [vmem:[#allocation2 + $0x58] sm:$0xff]  ;;  %v63_v4 = vld [vmem:[#allocation2 + $0x50] sm:$0xff]  ;;  %621 = vrcp.f32 %v731_v16  ;;  %vm92_vm1 = vcmask 490496   ;;  %vm151_vm3 = vcmask 1043456   ;;  %vm175_vm7 = vcmask 244736  }
   0xe   :  { %v62_v5 = vld [vmem:[#allocation2 + $0x48] sm:$0xff]  ;;  %v61_v6 = vld [vmem:[#allocation2 + $0x40] sm:$0xff]  ;;  %v60_v7 = vld [vmem:[#allocation2 + $0x38] sm:$0xff]  ;;  %vm223_vm8 = vcmask 1045504   ;;  %vm247_vm12 = vcmask 80896   ;;  %vm295_vm13 = vcmask 1041408  }
   0xf   :  { %74 = vmatpush.msra.mxu0 %v66_v1  ;;  %v59_v8 = vld [vmem:[#allocation2 + $0x30] sm:$0xff]  ;;  %v58_v9 = vld [vmem:[#allocation2 + $0x28] sm:$0xff]  ;;  %v57_v10 = vld [vmem:[#allocation2 + $0x20] sm:$0xff]  ;;  %s732_s6 = smov 125   ;;  %s582_s11 = sshll.u32 %s826_s4, 4  ;;  %s583_s11 = int_to_ptr.hbm [resolvable:$true] %s582_s11 }
  0x10   :  { %v56_v11 = vld [vmem:[#allocation2 + $0x18] sm:$0xff]  ;;  %v55_v12 = vld [vmem:[#allocation2 + $0x10] sm:$0xff]  ;;  %v54_v13 = vld [vmem:[#allocation2 + $0x8] sm:$0xff] }
  0x11   :  { %75 = vmatpush.msra.mxu0 %v65_v2  ;;  %v53_v14 = vld [vmem:[#allocation2] sm:$0xff]  ;;  %v147_v33 = vld [vmem:[#allocation2 + $0xb0] sm:$0xf]  ;;  %v146_v37 = vld [vmem:[#allocation2 + $0xa8] sm:$0xff] }
  0x12   :  { %v52_v15 = vld [vmem:[%s822_s0] sm:$0xff]  ;;  %598 = vmatpush.msk.msra.mxu1 %vm151_vm3, %v147_v33  ;;  %v144_v43 = vld [vmem:[#allocation2 + $0x98] sm:$0xff]  ;;  %v143_v46 = vld [vmem:[#allocation2 + $0x90] sm:$0xff] }
  0x13   :  { %76 = vmatpush.msra.mxu0 %v64_v3  ;;  %v622_v17 = vpop.eup %621  ;;  %v145_v40 = vld [vmem:[#allocation2 + $0xa0] sm:$0xff]  ;;  %v142_v48 = vld [vmem:[#allocation2 + $0x88] sm:$0xff]  ;;  %v140_v51 = vld [vmem:[#allocation2 + $0x78] sm:$0xff] }
  0x14   :  { %v101_v18 = vmul.f32 8.0, %v622_v17  ;;  %vm105_vm2 = vweird.f32 %v622_v17  ;;  %164 = vmatpush.msra.mxu1 %v146_v37  ;;  %v141_v49 = vld [vmem:[#allocation2 + $0x80] sm:$0xff] }
  0x15   :  { %77 = vmatpush.msra.mxu0 %v63_v4  ;;  %v119_v57 = vld [vmem:[#allocation5] sm:$0x1]  ;;  %v132_v61 = vld [vmem:[#allocation5 + $0x1] sm:$0x1] }
  0x16   :  { %v102_v19 = vsub.f32 1.0, %v101_v18  ;;  %165 = vmatpush.msra.mxu1 %v145_v40  ;;  %v208_v40 = vld [vmem:[#allocation5 + $0x3] sm:$0x1] }
  0x17   :  { %78 = vmatpush.msra.mxu0 %v62_v5 }
  0x18   :  { %v103_v24 = vmul.f32 %v622_v17, %v102_v19  ;;  %166 = vmatpush.msra.mxu1 %v144_v43 }
  0x19   :  { %79 = vmatpush.msra.mxu0 %v61_v6 }
  0x1a   :  { %v104_v30 = vadd.f32 %v622_v17, %v103_v24  ;;  %167 = vmatpush.msra.mxu1 %v143_v46  ;;  %v219_v24 = vld [vmem:[#allocation2 + $0xd0] sm:$0x3f] }
  0x1b   :  { %80 = vmatpush.msra.mxu0 %v60_v7  ;;  %600 = vmatpush.msk.msra.mxu2 %vm223_vm8, %v219_v24  ;;  %v329_v24 = vld [vmem:[#allocation2 + $0xe8] sm:$0x7] }
  0x1c   :  { %v777_v36 = vsel %vm105_vm2, %v622_v17, %v104_v30  ;;  %168 = vmatpush.msra.mxu1 %v142_v48 }
  0x1d   :  { %81 = vmatpush.msra.mxu0 %v59_v8 }
  0x1e   :  { %169 = vmatpush.msra.mxu1 %v141_v49 }
  0x1f   :  { %82 = vmatpush.msra.mxu0 %v58_v9 }
  0x20   :  { %170 = vmatpush.msra.mxu1 %v140_v51 }
  0x21   :  { %83 = vmatpush.msra.mxu0 %v57_v10 }
  0x23   :  { %84 = vmatpush.msra.mxu0 %v56_v11 }
  0x25   :  { %85 = vmatpush.msra.mxu0 %v55_v12 }
  0x27   :  { %86 = vmatpush.msra.mxu0 %v54_v13 }
  0x29   :  { %87 = vmatpush.msra.mxu0 %v53_v14 }
  0x2a   :  { %597 = vmatmul.msk.f32.vlgmr.msra.gmra.mxu0 %vm68_vm0, %v52_v15 }
  0xa7   :  { %v89_v20 = vpop.f32.mrf.mxu0 }
  0xa8   :  { %v93_v21 = vsel %vm92_vm1, %v89_v20, 0.0  ;;  %v108_v22 = vmul.f32 %v89_v20, %v89_v20 }
  0xa9   :  { %v94_v23 = vrot.slane %v93_v21, 4 }
  0xaa   :  { %v109_v25 = vsel %vm92_vm1, %v108_v22, 0.0 }
  0xab   :  { %v95_v26 = vadd.f32 %v94_v23, %v93_v21  ;;  %v110_v27 = vrot.slane %v109_v25, 4 }
  0xad   :  { %v96_v28 = vrot.slane %v95_v26, 2  ;;  %v111_v29 = vadd.f32 %v110_v27, %v109_v25  ;;  %v217_v27 = vld [vmem:[#allocation2 + $0xc0] sm:$0xff] }
  0xaf   :  { %v97_v31 = vadd.f32 %v96_v28, %v95_v26  ;;  %v112_v32 = vrot.slane %v111_v29, 2  ;;  %v218_v26 = vld [vmem:[#allocation2 + $0xc8] sm:$0xff] }
  0xb0   :  { %240 = vmatpush.msra.mxu2 %v218_v26 }
  0xb1   :  { %v98_v34 = vrot.slane %v97_v31, 1  ;;  %v113_v35 = vadd.f32 %v112_v32, %v111_v29  ;;  %v216_v29 = vld [vmem:[#allocation2 + $0xb8] sm:$0xff] }
  0xb2   :  { %241 = vmatpush.msra.mxu2 %v217_v27 }
  0xb3   :  { %v99_v38 = vadd.f32 %v98_v34, %v97_v31  ;;  %v114_v39 = vrot.slane %v113_v35, 1 }
  0xb4   :  { %242 = vmatpush.msra.mxu2 %v216_v29 }
  0xb5   :  { %v107_v41 = vmul.f32 %v777_v36, %v99_v38  ;;  %v115_v42 = vadd.f32 %v114_v39, %v113_v35  ;;  %v195_v35 = vld [vmem:[#allocation5 + $0x2] sm:$0x1] }
  0xb7   :  { %v116_v44 = vmul.f32 %v115_v42, %v777_v36  ;;  %v117_v45 = vmul.f32 %v107_v41, %v107_v41 }
  0xb9   :  { %v118_v47 = vsub.f32 %v116_v44, %v117_v45 }
  0xbb   :  { %v120_v50 = vadd.f32 1e-05, %v118_v47 }
  0xbd   :  { %623 = vrsqrt.f32 %v120_v50  ;;  %vm127_vm5 = vweird.f32 %v120_v50 }
  0xc3   :  { %v624_v52 = vpop.eup %623 }
  0xc4   :  { %v122_v53 = vmul.f32 %v624_v52, %v120_v50  ;;  %vm128_vm4 = vweird.f32 %v624_v52 }
  0xc5   :  { %vm129_vm6 = vmor %vm127_vm5, %vm128_vm4  ;;  %vm334_vm4 = vcmask 1042432   ;;  %vm573_vm5 = vcmask 48128  }
  0xc6   :  { %v123_v54 = vmul.f32 %v624_v52, %v122_v53 }
  0xc8   :  { %v124_v55 = vmul.f32 0.5, %v123_v54 }
  0xca   :  { %v125_v56 = vsub.f32 1.5, %v124_v55 }
  0xcc   :  { %v126_v58 = vmul.f32 %v624_v52, %v125_v56 }
  0xce   :  { %v130_v59 = vsel %vm129_vm6, %v624_v52, %v126_v58  ;;  %vm330_vm6 = vcmask 23552  }
  0xcf   :  { %v131_v60 = vmul.f32 %v130_v59, %v119_v57 }
  0xd1   :  { %v133_v62 = vmul.f32 %v131_v60, %v107_v41  ;;  %v135_v63 = vperm.slane %v131_v60, 0 }
  0xd3   :  { %v134_v0 = vsub.f32 %v132_v61, %v133_v62  ;;  %v136_v1 = vmul.f32 %v135_v63, %v89_v20 }
  0xd5   :  { %v137_v2 = vperm.slane %v134_v0, 0 }
  0xd7   :  { %v138_v3 = vadd.f32 %v137_v2, %v136_v1 }
  0xd9   :  { %625 = vtanh.f32 %v138_v3 }
  0xdf   :  { %v626_v4 = vpop.eup %625 }
  0xe0   :  { %599 = vmatmul.msk.f32.vlgmr.msra.gmra.mxu1 %vm92_vm1, %v626_v4  ;;  %v289_v4 = vld [vmem:[#allocation2 + $0xe0] sm:$0x3] }
  0xe1   :  { %602 = vmatpush.msk.msra.mxu3 %vm295_vm13, %v289_v4  ;;  %v390_v4 = vld [vmem:[#allocation5 + $0x8] sm:$0x1] }
 0x15d   :  { %v172_v5 = vpop.f32.mrf.mxu1 }
 0x15e   :  { %v176_v6 = vsel %vm175_vm7, %v172_v5, 0.0  ;;  %v184_v7 = vmul.f32 %v172_v5, %v172_v5 }
 0x15f   :  { %v177_v8 = vrot.slane %v176_v6, 4 }
 0x160   :  { %v185_v9 = vsel %vm175_vm7, %v184_v7, 0.0 }
 0x161   :  { %v178_v10 = vadd.f32 %v177_v8, %v176_v6  ;;  %v186_v11 = vrot.slane %v185_v9, 4 }
 0x163   :  { %v179_v12 = vrot.slane %v178_v10, 2  ;;  %v187_v13 = vadd.f32 %v186_v11, %v185_v9 }
 0x165   :  { %v180_v14 = vadd.f32 %v179_v12, %v178_v10  ;;  %v188_v15 = vrot.slane %v187_v13, 2  ;;  %v267_v12 = vld [vmem:[#allocation5 + $0x4] sm:$0x1] }
 0x167   :  { %v181_v16 = vrot.slane %v180_v14, 1  ;;  %v189_v17 = vadd.f32 %v188_v15, %v187_v13 }
 0x169   :  { %v182_v18 = vadd.f32 %v181_v16, %v180_v14  ;;  %v190_v19 = vrot.slane %v189_v17, 1  ;;  %v280_v16 = vld [vmem:[#allocation5 + $0x5] sm:$0x1] }
 0x16b   :  { %v183_v20 = vmul.f32 %v182_v18, %v777_v36  ;;  %v191_v21 = vadd.f32 %v190_v19, %v189_v17 }
 0x16d   :  { %v192_v22 = vmul.f32 %v191_v21, %v777_v36  ;;  %v193_v23 = vmul.f32 %v183_v20, %v183_v20 }
 0x16f   :  { %v194_v25 = vsub.f32 %v192_v22, %v193_v23 }
 0x171   :  { %v196_v28 = vadd.f32 1e-05, %v194_v25  ;;  %v619_v25 = vld [vmem:[#allocation5 + $0x6] ss:$0 sm:$0xff] }
 0x173   :  { %627 = vrsqrt.f32 %v196_v28  ;;  %vm203_vm10 = vweird.f32 %v196_v28 }
 0x179   :  { %v628_v30 = vpop.eup %627 }
 0x17a   :  { %v198_v31 = vmul.f32 %v628_v30, %v196_v28  ;;  %vm204_vm9 = vweird.f32 %v628_v30 }
 0x17b   :  { %vm205_vm11 = vmor %vm203_vm10, %vm204_vm9 }
 0x17c   :  { %v199_v32 = vmul.f32 %v628_v30, %v198_v31  ;;  %v319_v31 = vld [vmem:[%s823_s1] sm:$0xff]  ;;  %s733_s1 = smov [#allocation7]  }
 0x17e   :  { %v200_v33 = vmul.f32 0.5, %v199_v32 }
 0x180   :  { %v201_v34 = vsub.f32 1.5, %v200_v33 }
 0x182   :  { %v202_v37 = vmul.f32 %v628_v30, %v201_v34 }
 0x184   :  { %v206_v38 = vsel %vm205_vm11, %v628_v30, %v202_v37 }
 0x185   :  { %v207_v39 = vmul.f32 %v206_v38, %v195_v35 }
 0x187   :  { %v209_v41 = vmul.f32 %v207_v39, %v183_v20  ;;  %v211_v42 = vperm.slane %v207_v39, 0 }
 0x189   :  { %v210_v43 = vsub.f32 %v208_v40, %v209_v41  ;;  %v212_v44 = vmul.f32 %v211_v42, %v172_v5  ;;  %v288_v5 = vld [vmem:[#allocation2 + $0xd8] sm:$0xff] }
 0x18a   :  { %314 = vmatpush.msra.mxu3 %v288_v5 }
 0x18b   :  { %v213_v45 = vperm.slane %v210_v43, 0 }
 0x18c   :  { %604 = vmatpush.msk.msrb.mxu3 %vm334_vm4, %v329_v24 }
 0x18d   :  { %v214_v46 = vadd.f32 %v213_v45, %v212_v44 }
 0x18f   :  { %629 = vtanh.f32 %v214_v46 }
 0x195   :  { %v630_v47 = vpop.eup %629 }
 0x196   :  { %601 = vmatmul.msk.f32.vlgmr.msra.gmra.mxu2 %vm175_vm7, %v630_v47 }
 0x219   :  { %v244_v48 = vpop.f32.mrf.mxu2 }
 0x21a   :  { %v248_v49 = vsel %vm247_vm12, %v244_v48, 0.0  ;;  %v256_v50 = vmul.f32 %v244_v48, %v244_v48 }
 0x21b   :  { %v249_v51 = vrot.slane %v248_v49, 4 }
 0x21c   :  { %v257_v52 = vsel %vm247_vm12, %v256_v50, 0.0 }
 0x21d   :  { %v250_v53 = vadd.f32 %v249_v51, %v248_v49  ;;  %v258_v54 = vrot.slane %v257_v52, 4 }
 0x21f   :  { %v251_v55 = vrot.slane %v250_v53, 2  ;;  %v259_v56 = vadd.f32 %v258_v54, %v257_v52 }
 0x221   :  { %v252_v57 = vadd.f32 %v251_v55, %v250_v53  ;;  %v260_v58 = vrot.slane %v259_v56, 2 }
 0x223   :  { %v253_v59 = vrot.slane %v252_v57, 1  ;;  %v261_v60 = vadd.f32 %v260_v58, %v259_v56  ;;  %v399_v56 = vld [vmem:[#allocation2 + $0xf8] sm:$0x3] }
 0x224   :  { %606 = vmatpush.msk.msrb.mxu2 %vm295_vm13, %v399_v56 }
 0x225   :  { %v254_v61 = vadd.f32 %v253_v59, %v252_v57  ;;  %v262_v62 = vrot.slane %v261_v60, 1  ;;  %v398_v57 = vld [vmem:[#allocation2 + $0xf0] sm:$0xff] }
 0x226   :  { %421 = vmatpush.msrb.mxu2 %v398_v57 }
 0x227   :  { %v255_v63 = vmul.f32 %v254_v61, %v777_v36  ;;  %v263_v0 = vadd.f32 %v262_v62, %v261_v60 }
 0x229   :  { %v264_v1 = vmul.f32 %v263_v0, %v777_v36  ;;  %v265_v2 = vmul.f32 %v255_v63, %v255_v63  ;;  %v377_v0 = vld [vmem:[#allocation5 + $0x7] sm:$0x1] }
 0x22b   :  { %v266_v3 = vsub.f32 %v264_v1, %v265_v2 }
 0x22d   :  { %v268_v6 = vadd.f32 1e-05, %v266_v3 }
 0x22f   :  { %631 = vrsqrt.f32 %v268_v6  ;;  %vm275_vm15 = vweird.f32 %v268_v6 }
 0x235   :  { %v632_v7 = vpop.eup %631 }
 0x236   :  { %v270_v8 = vmul.f32 %v632_v7, %v268_v6  ;;  %vm276_vm14 = vweird.f32 %v632_v7 }
 0x237   :  { %vm277_vm2 = vmor %vm275_vm15, %vm276_vm14 }
 0x238   :  { %v271_v9 = vmul.f32 %v632_v7, %v270_v8 }
 0x23a   :  { %v272_v10 = vmul.f32 0.5, %v271_v9 }
 0x23c   :  { %v273_v11 = vsub.f32 1.5, %v272_v10 }
 0x23e   :  { %v274_v13 = vmul.f32 %v632_v7, %v273_v11 }
 0x240   :  { %v278_v14 = vsel %vm277_vm2, %v632_v7, %v274_v13 }
 0x241   :  { %v279_v15 = vmul.f32 %v278_v14, %v267_v12 }
 0x243   :  { %v281_v17 = vmul.f32 %v279_v15, %v255_v63  ;;  %v283_v18 = vperm.slane %v279_v15, 0 }
 0x245   :  { %v282_v19 = vsub.f32 %v280_v16, %v281_v17  ;;  %v284_v20 = vmul.f32 %v283_v18, %v244_v48 }
 0x247   :  { %v285_v21 = vperm.slane %v282_v19, 0 }
 0x249   :  { %v286_v22 = vadd.f32 %v285_v21, %v284_v20 }
 0x24b   :  { %633 = vtanh.f32 %v286_v22 }
 0x251   :  { %v634_v23 = vpop.eup %633 }
 0x252   :  { %603 = vmatmul.msk.f32.vlgmr.msra.gmra.mxu3 %vm247_vm12, %v634_v23 }
 0x2d5   :  { %v316_v26 = vpop.f32.mrf.mxu3 }
 0x2d6   :  { %v317_v27 = vadd.f32 %v619_v25, %v316_v26 }
 0x2d8   :  { %v320_v28 = vmul.f32 0.5, %v317_v27  ;;  %574 = vst.msk [vmem:[%s827_s5] sm:$0xff] %vm573_vm5, %v317_v27  ;;  %s580_s5 = sshll.u32 %s733_s1, 4  ;;  %s581_s5 = int_to_ptr.vmem [resolvable:$true] %s580_s5 }
 0x2da   :  { %v321_v29 = vmul.f32 1.442695, %v320_v28 }
 0x2dc   :  { %635 = vpow2.f32 %v321_v29 }
 0x2e2   :  { %v636_v30 = vpop.eup %635 }
 0x2e3   :  { %324 = vrot.lane.b32.xlu0 %v636_v30, %s732_s6 }
 0x355   :  { %v325_v32 = vpop.permute.xlu0 %324 }
 0x356   :  { %v327_v33 = vmul.f32 %v325_v32, %v319_v31  ;;  %v469_v31 = vld [vmem:[#allocation2 + $0x118] sm:$0x3f] }
 0x357   :  { %608 = vmatpush.msk.msra.mxu3 %vm223_vm8, %v469_v31 }
 0x358   :  { %v328_v34 = vadd.f32 %v327_v33, %v317_v27  ;;  %v468_v33 = vld [vmem:[#allocation2 + $0x110] sm:$0xff] }
 0x359   :  { %489 = vmatpush.msra.mxu3 %v468_v33 }
 0x35a   :  { %605 = vmatmul.msk.f32.vlgmr.msrb.gmra.mxu3 %vm330_vm6, %v328_v34  ;;  %v467_v34 = vld [vmem:[#allocation2 + $0x108] sm:$0xff] }
 0x35b   :  { %490 = vmatpush.msra.mxu3 %v467_v34 }
 0x3dd   :  { %v355_v35 = vpop.f32.mrf.mxu3 }
 0x3de   :  { %v358_v37 = vsel %vm247_vm12, %v355_v35, 0.0  ;;  %v366_v38 = vmul.f32 %v355_v35, %v355_v35 }
 0x3df   :  { %v359_v39 = vrot.slane %v358_v37, 4 }
 0x3e0   :  { %v367_v40 = vsel %vm247_vm12, %v366_v38, 0.0 }
 0x3e1   :  { %v360_v41 = vadd.f32 %v359_v39, %v358_v37  ;;  %v368_v42 = vrot.slane %v367_v40, 4  ;;  %v466_v37 = vld [vmem:[#allocation2 + $0x100] sm:$0xff] }
 0x3e2   :  { %491 = vmatpush.msra.mxu3 %v466_v37  ;;  %v620_v37 = vld [vmem:[#allocation5 + $0xd] ss:$0 sm:$0xff] }
 0x3e3   :  { %v361_v43 = vrot.slane %v360_v41, 2  ;;  %v369_v44 = vadd.f32 %v368_v42, %v367_v40 }
 0x3e5   :  { %v362_v45 = vadd.f32 %v361_v43, %v360_v41  ;;  %v370_v46 = vrot.slane %v369_v44, 2  ;;  %v445_v43 = vld [vmem:[#allocation5 + $0x9] sm:$0x1] }
 0x3e7   :  { %v363_v47 = vrot.slane %v362_v45, 1  ;;  %v371_v48 = vadd.f32 %v370_v46, %v369_v44 }
 0x3e9   :  { %v364_v49 = vadd.f32 %v363_v47, %v362_v45  ;;  %v372_v50 = vrot.slane %v371_v48, 1  ;;  %v458_v47 = vld [vmem:[#allocation5 + $0xa] sm:$0x1] }
 0x3eb   :  { %v365_v51 = vmul.f32 %v364_v49, %v777_v36  ;;  %v373_v52 = vadd.f32 %v372_v50, %v371_v48 }
 0x3ed   :  { %v374_v53 = vmul.f32 %v373_v52, %v777_v36  ;;  %v375_v54 = vmul.f32 %v365_v51, %v365_v51 }
 0x3ef   :  { %v376_v55 = vsub.f32 %v374_v53, %v375_v54 }
 0x3f1   :  { %v378_v58 = vadd.f32 1e-05, %v376_v55 }
 0x3f3   :  { %637 = vrsqrt.f32 %v378_v58  ;;  %vm385_vm10 = vweird.f32 %v378_v58 }
 0x3f9   :  { %v638_v59 = vpop.eup %637 }
 0x3fa   :  { %v380_v60 = vmul.f32 %v638_v59, %v378_v58  ;;  %vm386_vm9 = vweird.f32 %v638_v59 }
 0x3fb   :  { %vm387_vm11 = vmor %vm385_vm10, %vm386_vm9 }
 0x3fc   :  { %v381_v61 = vmul.f32 %v638_v59, %v380_v60 }
 0x3fe   :  { %v382_v62 = vmul.f32 0.5, %v381_v61 }
 0x400   :  { %v383_v63 = vsub.f32 1.5, %v382_v62 }
 0x402   :  { %v384_v1 = vmul.f32 %v638_v59, %v383_v63 }
 0x404   :  { %v388_v2 = vsel %vm387_vm11, %v638_v59, %v384_v1 }
 0x405   :  { %v389_v3 = vmul.f32 %v388_v2, %v377_v0  ;;  %v543_v2 = vld [vmem:[#allocation2 + $0x158] sm:$0xf] }
 0x406   :  { %610 = vmatpush.msk.msrb.mxu1 %vm151_vm3, %v543_v2 }
 0x407   :  { %v391_v5 = vmul.f32 %v389_v3, %v365_v51  ;;  %v393_v6 = vperm.slane %v389_v3, 0 }
 0x409   :  { %v392_v7 = vsub.f32 %v390_v4, %v391_v5  ;;  %v394_v8 = vmul.f32 %v393_v6, %v355_v35  ;;  %v542_v5 = vld [vmem:[#allocation2 + $0x150] sm:$0xff] }
 0x40a   :  { %561 = vmatpush.msrb.mxu1 %v542_v5 }
 0x40b   :  { %v395_v9 = vperm.slane %v392_v7, 0 }
 0x40d   :  { %v396_v10 = vadd.f32 %v395_v9, %v394_v8  ;;  %v541_v8 = vld [vmem:[#allocation2 + $0x148] sm:$0xff] }
 0x40e   :  { %562 = vmatpush.msrb.mxu1 %v541_v8 }
 0x40f   :  { %639 = vtanh.f32 %v396_v10 }
 0x415   :  { %v640_v11 = vpop.eup %639 }
 0x416   :  { %607 = vmatmul.msk.f32.vlgmr.msrb.gmra.mxu2 %vm247_vm12, %v640_v11  ;;  %v540_v11 = vld [vmem:[#allocation2 + $0x140] sm:$0xff] }
 0x417   :  { %563 = vmatpush.msrb.mxu1 %v540_v11 }
 0x499   :  { %v423_v12 = vpop.f32.mrf.mxu2 }
 0x49a   :  { %v426_v13 = vsel %vm175_vm7, %v423_v12, 0.0  ;;  %v434_v14 = vmul.f32 %v423_v12, %v423_v12 }
 0x49b   :  { %v427_v15 = vrot.slane %v426_v13, 4 }
 0x49c   :  { %v435_v16 = vsel %vm175_vm7, %v434_v14, 0.0  ;;  %v539_v14 = vld [vmem:[#allocation2 + $0x138] sm:$0xff] }
 0x49d   :  { %v428_v17 = vadd.f32 %v427_v15, %v426_v13  ;;  %v436_v18 = vrot.slane %v435_v16, 4  ;;  %564 = vmatpush.msrb.mxu1 %v539_v14 }
 0x49f   :  { %v429_v19 = vrot.slane %v428_v17, 2  ;;  %v437_v20 = vadd.f32 %v436_v18, %v435_v16  ;;  %v538_v16 = vld [vmem:[#allocation2 + $0x130] sm:$0xff] }
 0x4a0   :  { %565 = vmatpush.msrb.mxu1 %v538_v16 }
 0x4a1   :  { %v430_v21 = vadd.f32 %v429_v19, %v428_v17  ;;  %v438_v22 = vrot.slane %v437_v20, 2  ;;  %v537_v17 = vld [vmem:[#allocation2 + $0x128] sm:$0xff]  ;;  %v536_v19 = vld [vmem:[#allocation2 + $0x120] sm:$0xff] }
 0x4a2   :  { %566 = vmatpush.msrb.mxu1 %v537_v17 }
 0x4a3   :  { %v431_v23 = vrot.slane %v430_v21, 1  ;;  %v439_v24 = vadd.f32 %v438_v22, %v437_v20 }
 0x4a4   :  { %567 = vmatpush.msrb.mxu1 %v536_v19 }
 0x4a5   :  { %v432_v25 = vadd.f32 %v431_v23, %v430_v21  ;;  %v440_v26 = vrot.slane %v439_v24, 1 }
 0x4a7   :  { %v433_v27 = vmul.f32 %v432_v25, %v777_v36  ;;  %v441_v28 = vadd.f32 %v440_v26, %v439_v24 }
 0x4a9   :  { %v442_v29 = vmul.f32 %v441_v28, %v777_v36  ;;  %v443_v30 = vmul.f32 %v433_v27, %v433_v27  ;;  %v528_v28 = vld [vmem:[#allocation5 + $0xc] sm:$0x1] }
 0x4ab   :  { %v444_v32 = vsub.f32 %v442_v29, %v443_v30 }
 0x4ad   :  { %v446_v35 = vadd.f32 1e-05, %v444_v32 }
 0x4af   :  { %641 = vrsqrt.f32 %v446_v35  ;;  %vm453_vm13 = vweird.f32 %v446_v35 }
 0x4b5   :  { %v642_v38 = vpop.eup %641 }
 0x4b6   :  { %v448_v39 = vmul.f32 %v642_v38, %v446_v35  ;;  %vm454_vm12 = vweird.f32 %v642_v38 }
 0x4b7   :  { %vm455_vm14 = vmor %vm453_vm13, %vm454_vm12 }
 0x4b8   :  { %v449_v40 = vmul.f32 %v642_v38, %v448_v39 }
 0x4ba   :  { %v450_v41 = vmul.f32 0.5, %v449_v40 }
 0x4bc   :  { %v451_v42 = vsub.f32 1.5, %v450_v41 }
 0x4be   :  { %v452_v44 = vmul.f32 %v642_v38, %v451_v42 }
 0x4c0   :  { %v456_v45 = vsel %vm455_vm14, %v642_v38, %v452_v44 }
 0x4c1   :  { %v457_v46 = vmul.f32 %v456_v45, %v445_v43 }
 0x4c3   :  { %v459_v48 = vmul.f32 %v457_v46, %v433_v27  ;;  %v461_v49 = vperm.slane %v457_v46, 0 }
 0x4c5   :  { %v460_v50 = vsub.f32 %v458_v47, %v459_v48  ;;  %v462_v51 = vmul.f32 %v461_v49, %v423_v12 }
 0x4c7   :  { %v463_v52 = vperm.slane %v460_v50, 0 }
 0x4c9   :  { %v464_v53 = vadd.f32 %v463_v52, %v462_v51 }
 0x4cb   :  { %643 = vtanh.f32 %v464_v53 }
 0x4d1   :  { %v644_v54 = vpop.eup %643 }
 0x4d2   :  { %609 = vmatmul.msk.f32.vlgmr.msra.gmra.mxu3 %vm175_vm7, %v644_v54 }
 0x555   :  { %v493_v55 = vpop.f32.mrf.mxu3 }
 0x556   :  { %v496_v56 = vsel %vm92_vm1, %v493_v55, 0.0  ;;  %v504_v57 = vmul.f32 %v493_v55, %v493_v55 }
 0x557   :  { %v497_v58 = vrot.slane %v496_v56, 4 }
 0x558   :  { %v505_v59 = vsel %vm92_vm1, %v504_v57, 0.0 }
 0x559   :  { %v498_v60 = vadd.f32 %v497_v58, %v496_v56  ;;  %v506_v61 = vrot.slane %v505_v59, 4 }
 0x55b   :  { %v499_v62 = vrot.slane %v498_v60, 2  ;;  %v507_v63 = vadd.f32 %v506_v61, %v505_v59 }
 0x55d   :  { %v500_v0 = vadd.f32 %v499_v62, %v498_v60  ;;  %v508_v1 = vrot.slane %v507_v63, 2 }
 0x55f   :  { %v501_v3 = vrot.slane %v500_v0, 1  ;;  %v509_v4 = vadd.f32 %v508_v1, %v507_v63 }
 0x561   :  { %v502_v6 = vadd.f32 %v501_v3, %v500_v0  ;;  %v510_v7 = vrot.slane %v509_v4, 1 }
 0x563   :  { %v503_v9 = vmul.f32 %v502_v6, %v777_v36  ;;  %v511_v10 = vadd.f32 %v510_v7, %v509_v4 }
 0x565   :  { %v512_v12 = vmul.f32 %v511_v10, %v777_v36  ;;  %v513_v13 = vmul.f32 %v503_v9, %v503_v9  ;;  %v515_v36 = vld [vmem:[#allocation5 + $0xb] sm:$0x1] }
 0x567   :  { %v514_v15 = vsub.f32 %v512_v12, %v513_v13 }
 0x569   :  { %v516_v18 = vadd.f32 1e-05, %v514_v15 }
 0x56b   :  { %645 = vrsqrt.f32 %v516_v18  ;;  %vm523_vm7 = vweird.f32 %v516_v18 }
 0x571   :  { %v646_v20 = vpop.eup %645 }
 0x572   :  { %v518_v21 = vmul.f32 %v646_v20, %v516_v18  ;;  %vm524_vm3 = vweird.f32 %v646_v20 }
 0x573   :  { %vm525_vm8 = vmor %vm523_vm7, %vm524_vm3 }
 0x574   :  { %v519_v22 = vmul.f32 %v646_v20, %v518_v21 }
 0x576   :  { %v520_v23 = vmul.f32 0.5, %v519_v22 }
 0x578   :  { %v521_v24 = vsub.f32 1.5, %v520_v23 }
 0x57a   :  { %v522_v25 = vmul.f32 %v646_v20, %v521_v24 }
 0x57c   :  { %v526_v26 = vsel %vm525_vm8, %v646_v20, %v522_v25 }
 0x57d   :  { %v527_v27 = vmul.f32 %v526_v26, %v515_v36 }
 0x57f   :  { %v529_v29 = vmul.f32 %v527_v27, %v503_v9  ;;  %v531_v30 = vperm.slane %v527_v27, 0 }
 0x581   :  { %v530_v31 = vsub.f32 %v528_v28, %v529_v29  ;;  %v532_v32 = vmul.f32 %v531_v30, %v493_v55 }
 0x583   :  { %v533_v33 = vperm.slane %v530_v31, 0 }
 0x585   :  { %v534_v34 = vadd.f32 %v533_v33, %v532_v32 }
 0x587   :  { %647 = vtanh.f32 %v534_v34 }
 0x58d   :  { %v648_v35 = vpop.eup %647 }
 0x58e   :  { %611 = vmatmul.msk.f32.vlgmr.msrb.gmra.mxu1 %vm92_vm1, %v648_v35 }
 0x60b   :  { %v569_v38 = vpop.f32.mrf.mxu1 }
 0x60c   :  { %v570_v39 = vadd.f32 %v620_v37, %v569_v38 }
 0x60e   :  { %572 = vst.msk [vmem:[#allocation7] sm:$0xff] %vm68_vm0, %v570_v39 }
 0x60f   :  { %585 = dma.vmem_to_hbm [thread:$0]  %s581_s5, 128, %s583_s11, [#allocation4]  }
 0x610   :  { %725 = dma.done.wait [#allocation4], 128  }
 0x611   :  { %726 = vsyncadd [#allocation4], 4294967168 }
 0x612   :  { %594 = vsyncpa [#allocation3], 1 }
 0x613   :  { %595 = vsyncpa [#allocation6], 1 }
 0x614   :  { %596 = vsyncpa [#allocation4], 1 }

</bundles_post_ra>
